<compile_context>
chip_gen: v6e
topology: v6e:2x2x1
jax: 0.10.0
libtpu: 0.0.40
codegen_flags: <defaults>
</compile_context>

<pallas_src>
import numpy as np
import jax
import jax.numpy as jnp
from jax.experimental import pallas as pl
from jax.experimental.pallas import tpu as pltpu


def gin_kernel(kidx_ref, kcnt_ref,                 # scalar-prefetch (SMEM)
               eps_ref, adj_ref, xk_ref, xi_ref,
               w1_ref, b1_ref, w2_ref, b2_ref,     # inputs
               out_ref,                            # output
               acc_ref):                           # VMEM scratch (TM, O) f32
    i = pl.program_id(0)        # node-row tile     (parallel)
    s = pl.program_id(1)        # compressed k slot (reduction, arbitrary)

    @pl.when(s == 0)
    def _init():
        acc_ref[...] = jnp.zeros_like(acc_ref)

    # Skip padded slots (empty adjacency tiles). Their block index was clamped
    # to the previous non-empty tile, so no new DMA was issued either.
    @pl.when(s < kcnt_ref[i])
    def _accumulate():
        # Reassociated first MLP layer: acc += A_tile @ (x_tile @ W1).
        y_k = jnp.dot(xk_ref[...], w1_ref[...],
                      preferred_element_type=jnp.float32)
        a = adj_ref[...].astype(jnp.float32)       # bf16 counts -> exact f32
        acc_ref[...] += jnp.dot(a, y_k, preferred_element_type=jnp.float32)

    @pl.when(s == pl.num_programs(1) - 1)
    def _epilogue():
        # (1 + eps) * x self term, also folded through W1 (linearity).
        y_i = jnp.dot(xi_ref[...], w1_ref[...],
                      preferred_element_type=jnp.float32)
        h1 = (1.0 + eps_ref[0, 0]) * y_i + acc_ref[...] + b1_ref[...]
        h1 = jnp.maximum(h1, 0.0)                  # MLP inner activation
        h2 = jnp.dot(h1, w2_ref[...], preferred_element_type=jnp.float32)
        h2 = h2 + b2_ref[...]                      # plain_last: no act/norm
        out_ref[...] = jnp.maximum(h2, 0.0)        # outer self.activation


def _pick_tile(n_pad, candidates=(512, 256, 128)):
    for t in candidates:
        if n_pad % t == 0:
            return t
    return 128


def gin_conv_pallas(eps, adj_bf16, x_pad, kidx, kcnt, w1, b1, w2, b2, tm, tk):
    n_pad, d = x_pad.shape
    o = w2.shape[1]
    gi, gk = n_pad // tm, n_pad // tk

    flops = int(2 * n_pad * n_pad * o + 2 * (gi + 1) * n_pad * d * o
                + 2 * n_pad * o * o)
    bytes_accessed = int(2 * n_pad * n_pad                # bf16 adjacency
                         + 4 * n_pad * d * (gi + 1)       # streamed x + row tiles
                         + 4 * n_pad * o                  # output
                         + 4 * (d * o + o * o + 2 * o))   # weights

    grid_spec = pltpu.PrefetchScalarGridSpec(
        num_scalar_prefetch=2,                     # kidx, kcnt
        grid=(gi, gk),
        in_specs=[
            pl.BlockSpec(memory_space=pltpu.MemorySpace.SMEM),            # eps
            pl.BlockSpec((tm, tk), lambda i, s, kidx, kcnt: (i, kidx[i, s])),
            pl.BlockSpec((tk, d),  lambda i, s, kidx, kcnt: (kidx[i, s], 0)),
            pl.BlockSpec((tm, d),  lambda i, s, kidx, kcnt: (i, 0)),
            pl.BlockSpec((d, o),   lambda i, s, *_: (0, 0)),              # w1
            pl.BlockSpec((1, o),   lambda i, s, *_: (0, 0)),              # b1
            pl.BlockSpec((o, o),   lambda i, s, *_: (0, 0)),              # w2
            pl.BlockSpec((1, o),   lambda i, s, *_: (0, 0)),              # b2
        ],
        out_specs=pl.BlockSpec((tm, o), lambda i, s, *_: (i, 0)),
        scratch_shapes=[pltpu.VMEM((tm, o), jnp.float32)],
    )

    return pl.pallas_call(
        gin_kernel,
        out_shape=jax.ShapeDtypeStruct((n_pad, o), jnp.float32),
        grid_spec=grid_spec,
        compiler_params=pltpu.CompilerParams(
            dimension_semantics=("parallel", "arbitrary"),
            vmem_limit_bytes=32 * 1024 * 1024,
        ),
        cost_estimate=pl.CostEstimate(flops=flops, transcendentals=0,
                                      bytes_accessed=bytes_accessed),
    )(kidx, kcnt, eps, adj_bf16, x_pad, x_pad, w1, b1, w2, b2)


def molecule_gnn_gin_forward(params, x, edge_index, ntypes, etypes,
                             eattr=None, batch=None):
    """Glue (embedding lookup, concat, adjacency/tiling metadata) + Pallas hot path."""
    # _embed_types_and_cat
    ntype_embs = params["ntype_emb"][ntypes]
    x_cat = jnp.concatenate([ntype_embs, x], axis=-1).astype(jnp.float32)
    if eattr is not None:
        etype_embs = params["etype_emb"][etypes]
        _eattr_cat = jnp.concatenate([etype_embs, eattr], axis=-1)  # GIN ignores it

    n, d = x_cat.shape

    # Pad nodes to a multiple of 128 so (TM, TK) adjacency tiles satisfy the
    # (8, 128) tiling constraint; padded rows/cols are zero and sliced off.
    n_pad = ((n + 127) // 128) * 128
    tm = _pick_tile(n_pad)
    tk = _pick_tile(n_pad)
    gi, gk = n_pad // tm, n_pad // tk

    x_pad = jnp.zeros((n_pad, d), jnp.float32).at[:n, :].set(x_cat)

    # Dense adjacency for sum aggregation: A[target, source] = #edges.
    src, dst = edge_index[0], edge_index[1]
    adj = jnp.zeros((n_pad, n_pad), jnp.float32).at[dst, src].add(1.0)
    adj_bf16 = adj.astype(jnp.bfloat16)        # small integer counts: exact

    # Per (row-tile, k-tile) occupancy -> compressed non-empty k indices and
    # counts; padded slots are clamped to the last non-empty index so the
    # pipeline issues no new DMA for them and pl.when skips their compute.
    tile_used = adj.reshape(gi, tm, gk, tk).sum(axis=(1, 3)) > 0        # (gi, gk)
    kcnt = tile_used.sum(axis=1).astype(jnp.int32)                      # (gi,)
    order = jnp.argsort((~tile_used).astype(jnp.int32), axis=1)         # stable
    kidx = order.astype(jnp.int32)                                      # (gi, gk)
    last = jnp.maximum(kcnt - 1, 0)
    clamp = kidx[jnp.arange(gi), last][:, None]
    kidx = jnp.where(jnp.arange(gk)[None, :] < kcnt[:, None], kidx, clamp)

    out_pad = gin_conv_pallas(params["eps"], adj_bf16, x_pad, kidx, kcnt,
                              params["w1"], params["b1"],
                              params["w2"], params["b2"], tm, tk)
    return out_pad[:n]


def reference_forward_numpy(params, x, edge_index, ntypes, etypes):
    """float64 numpy reference of the same forward pass (ground truth)."""
    ntype_emb = np.asarray(params["ntype_emb"], np.float64)
    w1 = np.asarray(params["w1"], np.float64)
    b1 = np.asarray(params["b1"], np.float64)
    w2 = np.asarray(params["w2"], np.float64)
    b2 = np.asarray(params["b2"], np.float64)
    eps = float(np.asarray(params["eps"])[0, 0])

    x_np = np.asarray(x, np.float64)
    nt = np.asarray(ntypes)
    src = np.asarray(edge_index[0])
    dst = np.asarray(edge_index[1])

    x_cat = np.concatenate([ntype_emb[nt], x_np], axis=-1)
    agg = np.zeros_like(x_cat)
    np.add.at(agg, dst, x_cat[src])                    # sum aggregation
    h = (1.0 + eps) * x_cat + agg
    h1 = np.maximum(h @ w1 + b1, 0.0)
    h2 = h1 @ w2 + b2
    return np.maximum(h2, 0.0)


if __name__ == "__main__":
    # small shapes consistent with the module's forward signature
    N = 300
    in_channels, edge_dim = 12, 6
    num_ntypes, num_etypes = 5, 4
    ntype_emb_dim, etype_emb_dim = 4, 4
    out_channels = 8               # hidden_channels unused when num_convs=1
    D = in_channels + ntype_emb_dim

    key = jax.random.PRNGKey(0)
    ks = jax.random.split(key, 16)

    # Block-structured sparse graph so some adjacency tiles are empty and the
    # scalar-prefetch tile-skip path is actually exercised.
    E1, E2 = 512, 128
    src = jnp.concatenate([
        jax.random.randint(ks[0], (E1,), 0, 160, dtype=jnp.int32),
        jax.random.randint(ks[1], (E2,), 192, N, dtype=jnp.int32)])
    dst = jnp.concatenate([
        jax.random.randint(ks[2], (E1,), 0, 160, dtype=jnp.int32),
        jax.random.randint(ks[3], (E2,), 192, N, dtype=jnp.int32)])
    edge_index = jnp.stack([src, dst])
    E = E1 + E2

    x = jax.random.normal(ks[4], (N, in_channels), jnp.float32)
    ntypes = jax.random.randint(ks[5], (N,), 0, num_ntypes, dtype=jnp.int32)
    etypes = jax.random.randint(ks[6], (E,), 0, num_etypes, dtype=jnp.int32)
    eattr = jax.random.normal(ks[7], (E, edge_dim), jnp.float32)

    # deterministic parameter init (synthetic, not a checkpoint)
    params = {
        "ntype_emb": jax.random.normal(ks[8], (num_ntypes, ntype_emb_dim), jnp.float32),
        "etype_emb": jax.random.normal(ks[9], (num_etypes, etype_emb_dim), jnp.float32),
        "w1": jax.random.normal(ks[10], (D, out_channels), jnp.float32) / np.sqrt(D),
        "b1": 0.1 * jax.random.normal(ks[11], (1, out_channels), jnp.float32),
        "w2": jax.random.normal(ks[12], (out_channels, out_channels), jnp.float32)
              / np.sqrt(out_channels),
        "b2": 0.1 * jax.random.normal(ks[13], (1, out_channels), jnp.float32),
        # GINConv eps init is 0.0; use a nonzero value so the eps code path is
        # actually exercised by the correctness check.
        "eps": jnp.full((1, 1), 0.1, jnp.float32),
    }

    out = molecule_gnn_gin_forward(params, x, edge_index, ntypes, etypes, eattr=eattr)
    out = jax.block_until_ready(out)

    ref = reference_forward_numpy(params, x, edge_index, ntypes, etypes)
    # Tolerance chosen to be robust to the TPU MXU f32-matmul pass mode while
    # still catching any semantic error (missing bias / relu / eps / wrong
    # aggregation all produce O(0.05 .. 1) deviations).
    np.testing.assert_allclose(np.asarray(out, np.float64), ref,
                               rtol=5e-3, atol=5e-3)

    print("KERNEL_OK")
</pallas_src>

<mosaic_0001>
module attributes {stable_mosaic.version = 11 : i64} {
  func.func @gin_kernel(%arg0: i32, %arg1: i32, %arg2: memref<3x3xi32, #tpu.memory_space<smem>>, %arg3: memref<3xi32, #tpu.memory_space<smem>>, %arg4: memref<1x1xf32, #tpu.memory_space<smem>>, %arg5: memref<128x128xbf16, #tpu.memory_space<vmem>>, %arg6: memref<128x16xf32, #tpu.memory_space<vmem>>, %arg7: memref<128x16xf32, #tpu.memory_space<vmem>>, %arg8: memref<16x8xf32, #tpu.memory_space<vmem>>, %arg9: memref<1x8xf32, #tpu.memory_space<vmem>>, %arg10: memref<8x8xf32, #tpu.memory_space<vmem>>, %arg11: memref<1x8xf32, #tpu.memory_space<vmem>>, %arg12: memref<128x8xf32, #tpu.memory_space<vmem>>, %arg13: memref<128x8xf32, #tpu.memory_space<vmem>>) attributes {dimension_semantics = [#tpu.dimension_semantics<parallel>, #tpu.dimension_semantics<arbitrary>], iteration_bounds = array<i64: 3, 3>, scalar_prefetch = 2 : i64, scratch_operands = 1 : i64, tpu.core_type = #tpu.core_type<tc>, window_params = [{transform_indices = @transform_0, window_bounds = array<i64: 1, 1>}, {transform_indices = @transform_1, window_bounds = array<i64: 128, 128>}, {transform_indices = @transform_2, window_bounds = array<i64: 128, 16>}, {transform_indices = @transform_3, window_bounds = array<i64: 128, 16>}, {pipeline_mode = #tpu.pipeline_mode<synchronous>, transform_indices = @transform_4, window_bounds = array<i64: 16, 8>}, {pipeline_mode = #tpu.pipeline_mode<synchronous>, transform_indices = @transform_5, window_bounds = array<i64: 1, 8>}, {pipeline_mode = #tpu.pipeline_mode<synchronous>, transform_indices = @transform_6, window_bounds = array<i64: 8, 8>}, {pipeline_mode = #tpu.pipeline_mode<synchronous>, transform_indices = @transform_7, window_bounds = array<i64: 1, 8>}, {transform_indices = @transform_8, window_bounds = array<i64: 128, 8>}]} {
    %c0_i32 = arith.constant 0 : i32
    %0 = arith.cmpi eq, %arg1, %c0_i32 : i32
    %1 = arith.extui %0 : i1 to i32
    %c0_i32_0 = arith.constant 0 : i32
    %2 = arith.cmpi ne, %1, %c0_i32_0 : i32
    scf.if %2 {
      %cst = arith.constant 0.000000e+00 : f32
      %11 = vector.broadcast %cst : f32 to vector<128x8xf32>
      %c0 = arith.constant 0 : index
      %c0_3 = arith.constant 0 : index
      %12 = vector.load %arg13[%c0, %c0_3] : memref<128x8xf32, #tpu.memory_space<vmem>>, vector<128x8xf32>
      tpu.vector_store %arg13[%c0, %c0_3], %11 {strides = array<i32>} : memref<128x8xf32, #tpu.memory_space<vmem>>, vector<128x8xf32>,
    } else {
    }
    %3 = arith.index_cast %arg0 : i32 to index
    %4 = memref.load %arg3[%3] : memref<3xi32, #tpu.memory_space<smem>>
    %5 = arith.cmpi slt, %arg1, %4 : i32
    %6 = arith.extui %5 : i1 to i32
    %c0_i32_1 = arith.constant 0 : i32
    %7 = arith.cmpi ne, %6, %c0_i32_1 : i32
    scf.if %7 {
      %c0 = arith.constant 0 : index
      %c0_3 = arith.constant 0 : index
      %11 = vector.load %arg6[%c0, %c0_3] : memref<128x16xf32, #tpu.memory_space<vmem>>, vector<128x16xf32>
      %c0_4 = arith.constant 0 : index
      %c0_5 = arith.constant 0 : index
      %12 = vector.load %arg8[%c0_4, %c0_5] : memref<16x8xf32, #tpu.memory_space<vmem>>, vector<16x8xf32>
      %cst = arith.constant dense<0.000000e+00> : vector<128x8xf32>
      %13 = tpu.matmul %11, %12, %cst {dimension_numbers = #tpu.dot_dimension_numbers<[1], [0], [0], [1], [0, 0, 1, 1], [], []>} : vector<128x16xf32>, vector<16x8xf32>, vector<128x8xf32> -> vector<128x8xf32>
      %c0_6 = arith.constant 0 : index
      %c0_7 = arith.constant 0 : index
      %14 = vector.load %arg5[%c0_6, %c0_7] : memref<128x128xbf16, #tpu.memory_space<vmem>>, vector<128x128xbf16>
      %15 = arith.extf %14 : vector<128x128xbf16> to vector<128x128xf32>
      %c0_8 = arith.constant 0 : index
      %c0_9 = arith.constant 0 : index
      %16 = vector.load %arg13[%c0_8, %c0_9] : memref<128x8xf32, #tpu.memory_space<vmem>>, vector<128x8xf32>
      %cst_10 = arith.constant dense<0.000000e+00> : vector<128x8xf32>
      %17 = tpu.matmul %15, %13, %cst_10 {dimension_numbers = #tpu.dot_dimension_numbers<[1], [0], [0], [1], [0, 0, 1, 1], [], []>} : vector<128x128xf32>, vector<128x8xf32>, vector<128x8xf32> -> vector<128x8xf32>
      %18 = arith.addf %16, %17 : vector<128x8xf32>
      %c0_11 = arith.constant 0 : index
      %c0_12 = arith.constant 0 : index
      %19 = vector.load %arg13[%c0_11, %c0_12] : memref<128x8xf32, #tpu.memory_space<vmem>>, vector<128x8xf32>
      tpu.vector_store %arg13[%c0_11, %c0_12], %18 {strides = array<i32>} : memref<128x8xf32, #tpu.memory_space<vmem>>, vector<128x8xf32>,
    } else {
    }
    %c2_i32 = arith.constant 2 : i32
    %8 = arith.cmpi eq, %arg1, %c2_i32 : i32
    %9 = arith.extui %8 : i1 to i32
    %c0_i32_2 = arith.constant 0 : i32
    %10 = arith.cmpi ne, %9, %c0_i32_2 : i32
    scf.if %10 {
      %c0 = arith.constant 0 : index
      %c0_3 = arith.constant 0 : index
      %11 = vector.load %arg7[%c0, %c0_3] : memref<128x16xf32, #tpu.memory_space<vmem>>, vector<128x16xf32>
      %c0_4 = arith.constant 0 : index
      %c0_5 = arith.constant 0 : index
      %12 = vector.load %arg8[%c0_4, %c0_5] : memref<16x8xf32, #tpu.memory_space<vmem>>, vector<16x8xf32>
      %cst = arith.constant dense<0.000000e+00> : vector<128x8xf32>
      %13 = tpu.matmul %11, %12, %cst {dimension_numbers = #tpu.dot_dimension_numbers<[1], [0], [0], [1], [0, 0, 1, 1], [], []>} : vector<128x16xf32>, vector<16x8xf32>, vector<128x8xf32> -> vector<128x8xf32>
      %c0_6 = arith.constant 0 : index
      %c0_7 = arith.constant 0 : index
      %14 = memref.load %arg4[%c0_6, %c0_7] : memref<1x1xf32, #tpu.memory_space<smem>>
      %cst_8 = arith.constant 1.000000e+00 : f32
      %15 = arith.addf %cst_8, %14 : f32
      %16 = vector.broadcast %15 : f32 to vector<128x8xf32>
      %17 = arith.mulf %16, %13 : vector<128x8xf32>
      %c0_9 = arith.constant 0 : index
      %c0_10 = arith.constant 0 : index
      %18 = vector.load %arg13[%c0_9, %c0_10] : memref<128x8xf32, #tpu.memory_space<vmem>>, vector<128x8xf32>
      %19 = arith.addf %17, %18 : vector<128x8xf32>
      %c0_11 = arith.constant 0 : index
      %c0_12 = arith.constant 0 : index
      %20 = vector.load %arg9[%c0_11, %c0_12] : memref<1x8xf32, #tpu.memory_space<vmem>>, vector<1x8xf32>
      %21 = vector.broadcast %20 : vector<1x8xf32> to vector<128x8xf32>
      %22 = arith.addf %19, %21 : vector<128x8xf32>
      %cst_13 = arith.constant 0.000000e+00 : f32
      %23 = vector.broadcast %cst_13 : f32 to vector<128x8xf32>
      %24 = arith.maximumf %22, %23 : vector<128x8xf32>
      %c0_14 = arith.constant 0 : index
      %c0_15 = arith.constant 0 : index
      %25 = vector.load %arg10[%c0_14, %c0_15] : memref<8x8xf32, #tpu.memory_space<vmem>>, vector<8x8xf32>
      %cst_16 = arith.constant dense<0.000000e+00> : vector<128x8xf32>
      %26 = tpu.matmul %24, %25, %cst_16 {dimension_numbers = #tpu.dot_dimension_numbers<[1], [0], [0], [1], [0, 0, 1, 1], [], []>} : vector<128x8xf32>, vector<8x8xf32>, vector<128x8xf32> -> vector<128x8xf32>
      %c0_17 = arith.constant 0 : index
      %c0_18 = arith.constant 0 : index
      %27 = vector.load %arg11[%c0_17, %c0_18] : memref<1x8xf32, #tpu.memory_space<vmem>>, vector<1x8xf32>
      %28 = vector.broadcast %27 : vector<1x8xf32> to vector<128x8xf32>
      %29 = arith.addf %26, %28 : vector<128x8xf32>
      %cst_19 = arith.constant 0.000000e+00 : f32
      %30 = vector.broadcast %cst_19 : f32 to vector<128x8xf32>
      %31 = arith.maximumf %29, %30 : vector<128x8xf32>
      %c0_20 = arith.constant 0 : index
      %c0_21 = arith.constant 0 : index
      %32 = vector.load %arg12[%c0_20, %c0_21] : memref<128x8xf32, #tpu.memory_space<vmem>>, vector<128x8xf32>
      tpu.vector_store %arg12[%c0_20, %c0_21], %31 {strides = array<i32>} : memref<128x8xf32, #tpu.memory_space<vmem>>, vector<128x8xf32>,
    } else {
    }
    return
  }
  func.func @transform_0(%arg0: i32, %arg1: i32, %arg2: memref<3x3xi32, #tpu.memory_space<smem>>, %arg3: memref<3xi32, #tpu.memory_space<smem>>) -> (i32, i32) {
    %c0_i32 = arith.constant 0 : i32
    %c0_i32_0 = arith.constant 0 : i32
    %c0_i32_1 = arith.constant 0 : i32
    return %c0_i32, %c0_i32_0 : i32, i32
  }
  func.func @transform_1(%arg0: i32, %arg1: i32, %arg2: memref<3x3xi32, #tpu.memory_space<smem>>, %arg3: memref<3xi32, #tpu.memory_space<smem>>) -> (i32, i32) {
    %0 = arith.index_cast %arg0 : i32 to index
    %1 = arith.index_cast %arg1 : i32 to index
    %2 = memref.load %arg2[%0, %1] : memref<3x3xi32, #tpu.memory_space<smem>>
    %c0_i32 = arith.constant 0 : i32
    return %arg0, %2 : i32, i32
  }
  func.func @transform_2(%arg0: i32, %arg1: i32, %arg2: memref<3x3xi32, #tpu.memory_space<smem>>, %arg3: memref<3xi32, #tpu.memory_space<smem>>) -> (i32, i32) {
    %0 = arith.index_cast %arg0 : i32 to index
    %1 = arith.index_cast %arg1 : i32 to index
    %2 = memref.load %arg2[%0, %1] : memref<3x3xi32, #tpu.memory_space<smem>>
    %c0_i32 = arith.constant 0 : i32
    %c0_i32_0 = arith.constant 0 : i32
    return %2, %c0_i32 : i32, i32
  }
  func.func @transform_3(%arg0: i32, %arg1: i32, %arg2: memref<3x3xi32, #tpu.memory_space<smem>>, %arg3: memref<3xi32, #tpu.memory_space<smem>>) -> (i32, i32) {
    %c0_i32 = arith.constant 0 : i32
    %c0_i32_0 = arith.constant 0 : i32
    return %arg0, %c0_i32 : i32, i32
  }
  func.func @transform_4(%arg0: i32, %arg1: i32, %arg2: memref<3x3xi32, #tpu.memory_space<smem>>, %arg3: memref<3xi32, #tpu.memory_space<smem>>) -> (i32, i32) {
    %c0_i32 = arith.constant 0 : i32
    %c0_i32_0 = arith.constant 0 : i32
    %c0_i32_1 = arith.constant 0 : i32
    return %c0_i32, %c0_i32_0 : i32, i32
  }
  func.func @transform_5(%arg0: i32, %arg1: i32, %arg2: memref<3x3xi32, #tpu.memory_space<smem>>, %arg3: memref<3xi32, #tpu.memory_space<smem>>) -> (i32, i32) {
    %c0_i32 = arith.constant 0 : i32
    %c0_i32_0 = arith.constant 0 : i32
    %c0_i32_1 = arith.constant 0 : i32
    return %c0_i32, %c0_i32_0 : i32, i32
  }
  func.func @transform_6(%arg0: i32, %arg1: i32, %arg2: memref<3x3xi32, #tpu.memory_space<smem>>, %arg3: memref<3xi32, #tpu.memory_space<smem>>) -> (i32, i32) {
    %c0_i32 = arith.constant 0 : i32
    %c0_i32_0 = arith.constant 0 : i32
    %c0_i32_1 = arith.constant 0 : i32
    return %c0_i32, %c0_i32_0 : i32, i32
  }
  func.func @transform_7(%arg0: i32, %arg1: i32, %arg2: memref<3x3xi32, #tpu.memory_space<smem>>, %arg3: memref<3xi32, #tpu.memory_space<smem>>) -> (i32, i32) {
    %c0_i32 = arith.constant 0 : i32
    %c0_i32_0 = arith.constant 0 : i32
    %c0_i32_1 = arith.constant 0 : i32
    return %c0_i32, %c0_i32_0 : i32, i32
  }
  func.func @transform_8(%arg0: i32, %arg1: i32, %arg2: memref<3x3xi32, #tpu.memory_space<smem>>, %arg3: memref<3xi32, #tpu.memory_space<smem>>) -> (i32, i32) {
    %c0_i32 = arith.constant 0 : i32
    %c0_i32_0 = arith.constant 0 : i32
    return %arg0, %c0_i32 : i32, i32
  }
}

</mosaic_0001>

<bundles_post_ra>
// kernel: tpu_custom_call.1
= control target key start
LH: loop header
LB: loop body
LE: loop exit
PB: predicated region body
PF: predicated region fallthrough
CT: control target
= control target key end

     0   :  { %s2628_s0 = inlined_call_operand.vmem [shape: s32[3,3], index: 0, kind: input, shape index: {}]   ;;  %s2629_s3 = inlined_call_operand.vmem [shape: bf16[384,384], index: 3, kind: input, shape index: {}]   ;;  %s2630_s4 = inlined_call_operand.vmem [shape: f32[384,16], index: 4, kind: input, shape index: {}]   ;;  %s2631_s5 = inlined_call_operand.vmem [shape: f32[384,16], index: 5, kind: input, shape index: {}]   ;;  %s2632_s6 = inlined_call_operand.vmem [shape: f32[16,8], index: 6, kind: input, shape index: {}]   ;;  %s2633_s7 = inlined_call_operand.vmem [shape: f32[1,8], index: 7, kind: input, shape index: {}]   ;;  %s2634_s8 = inlined_call_operand.vmem [shape: f32[8,8], index: 8, kind: input, shape index: {}]   ;;  %s2635_s9 = inlined_call_operand.vmem [shape: f32[1,8], index: 9, kind: input, shape index: {}]   ;;  %s2636_s10 = inlined_call_operand.vmem [shape: f32[384,8], index: 10, kind: output, shape index: {}]   ;;  %s2637_s1 = inlined_call_operand.vmem [shape: s32[3], index: 1, kind: input, shape index: {}]   ;;  %s2638_s2 = inlined_call_operand.<no memory space> [shape: f32[1,1], index: 2, kind: input, shape index: {}]  }
   0x1   :  { %s15_s15 = sshll.u32 %s2628_s0, 4  ;;  %s19_s18 = sshll.u32 %s2637_s1, 4  ;;  %s16_s15 = int_to_ptr.vmem [resolvable:$true] %s15_s15  ;;  %s20_s18 = int_to_ptr.vmem [resolvable:$true] %s19_s18 }
   0x2   :  { %s2108_s19 = scalar_lea.vmem %s16_s15, 64  ;;  %p2113_p1 = scmp.lt.s32.totalorder %s16_s15, %s16_s15 }
   0x3   :  { %p2109_p0 = scmp.ne.s32.totalorder %s16_s15, %s2108_s19  ;;  %p2114_p2 = scmp.lt.s32.totalorder %s2108_s19, %s2108_s19 }
   0x5   :  { %p2115_p3 = por %p2114_p2, %p2113_p1 }
   0x7   :  { %p2116_p4 = pnand %p2115_p3, %p2109_p0 }
   0x9   :  { %2119 = shalt.err (!%p2116_p4)  }
   0xa   :  { %s2190_s20 = smov [#allocation4]   ;;  %s2120_s21 = scalar_lea.vmem %s20_s18, 16 }
   0xb   :  { %18 = dma.vmem_to_smem %s16_s15, 64, %s2190_s20, [#allocation3] }
   0xc   :  { %p2121_p5 = scmp.ne.s32.totalorder %s20_s18, %s2120_s21  ;;  %p2125_p6 = scmp.lt.s32.totalorder %s20_s18, %s20_s18 }
   0xd   :  { %p2126_p7 = scmp.lt.s32.totalorder %s2120_s21, %s2120_s21 }
   0xf   :  { %p2127_p8 = por %p2126_p7, %p2125_p6 }
  0x11   :  { %p2128_p9 = pnand %p2127_p8, %p2121_p5 }
  0x13   :  { %2131 = shalt.err (!%p2128_p9)  }
  0x14   :  { %s2191_s0 = smov [#allocation5]   ;;  %23 = sst [smem:[#allocation6]] %s2638_s2 }
  0x15   :  { %22 = dma.vmem_to_smem %s20_s18, 16, %s2191_s0, [#allocation3] }
  0x16   :  { %2160 = dma.done.wait [#allocation3], 80 }
  0x17   :  { %2161 = vsyncadd [#allocation3], 4294967216 }
  0x18   :  { %25 = sfence }
  0x19   :  { %s2257_s23 = smov 0   ;;  %s2259_s24 = smov 0  }
  0x1a   :  { %s2261_s25 = smov 0   ;;  %s2263_s26 = smov 0  }
  0x1b   :  { %s2265_s27 = smov 0   ;;  %s2267_s28 = smov 0  }
  0x1c   :  { %s2269_s29 = smov 0  }
  0x1d LB: > { %s40_s2 = sadd.s32 1, %s2180_s27  ;;  %s43_s30 = sadd.s32 1, %s2184_s28  ;;  %s2188_s29 = sphi %s2269_s29, %s31_s29   ;;  %s2184_s28 = sphi %s2267_s28, %s2650_s28   ;;  %s2180_s27 = sphi %s2265_s27, %s2649_s27   ;;  %s2176_s26 = sphi %s2263_s26, %s2648_s26   ;;  %s2172_s25 = sphi %s2261_s25, %s2647_s25   ;;  %s2168_s24 = sphi %s2259_s24, %s2646_s24   ;;  %s2164_s23 = sphi %s2257_s23, %s2645_s23  }
  0x1e   : > { %p41_p10 = scmp.ge.s32.totalorder %s40_s2, 3  ;;  %s68_s11 = sshra.s32 %s2180_s27, 7 }
  0x1f   : > { %s70_s12 = sadd.s32 %s2184_s28, %s68_s11  ;;  %s73_s13 = sand.u32 127, %s2180_s27 }
  0x20   : > { %s2652_s2 = smov (%p41_p10, %s40_s2), 0  ;;  %s2654_s30 = smov (!%p41_p10, %s43_s30), %s2184_s28 }
  0x21   : > { %2641 = sst [smem:[#allocation9_spill]] %s2652_s2  ;;  %s1679_s14 = sshll.u32 %s70_s12, 7 }
  0x22   : > { %p45_p11 = scmp.ge.s32.totalorder %s2654_s30, 3  ;;  %s74_s15 = sadd.s32 %s1679_s14, %s73_s13 }
  0x23   : > { %s76_s16 = sshra.s32 %s2652_s2, 7  ;;  %s81_s17 = sand.u32 127, %s2652_s2 }
  0x24   : > { %s2656_s30 = smov (%p45_p11, %s2654_s30), 0  ;;  %p96_p12 = scmp.ne.s32.totalorder %s2168_s24, %s2164_s23 }
  0x25   : > { %2642 = sst [smem:[#allocation10_spill]] %s2656_s30  ;;  %s78_s19 = sadd.s32 %s76_s16, %s2656_s30 }
  0x26   : > { %s75_s18 = sld [smem:[#allocation4 + %s74_s15]]  ;;  %s1680_s20 = sshll.u32 %s78_s19, 7 }
  0x27   : > { %p97_p13 = scmp.eq.s32.totalorder %s2188_s29, 0  ;;  %s82_s21 = sadd.s32 %s1680_s20, %s81_s17 }
  0x28   : > { %s83_s0 = sld [smem:[#allocation4 + %s82_s21]]  ;;  %s84_s1 = ssub.s32 %s2184_s28, %s2656_s30 }
  0x29   : > { %p98_p0 = por %p97_p13, %p96_p12  ;;  %s89_s12 = sadd.s32 1, %s2168_s24 }
  0x2a   : > { %p1684_p2 = scmp.ge.s32.totalorder %s2188_s29, 9 }
  0x2e   : > { %s85_s22 = ssub.s32 %s75_s18, %s83_s0  ;;  %315 = sbr.rel (%p1684_p2) target bundleno = 71 (0x47), region = 36 }
  0x2f   : > { %s86_s11 = sor.u32 %s85_s22, %s84_s1 }
  0x30   : > { %p87_p1 = scmp.eq.s32.totalorder %s86_s11, 0 }
  0x32   : > { %s2312_s13 = scalar_select %p87_p1, %s2168_s24, %s89_s12  }
  0x33   : > { %318 = sbr.rel (!%p98_p0) target bundleno = 71 (0x47), region = 40  ;;  %s330_s14 = sld [smem:[#allocation4 + %s74_s15]] (%p98_p0) }
  0x34   : > { %s320_s16 = sand.u32 (%p98_p0), 1, %s2168_s24   ;;  %s2048_s19 = smul.u32 (%p98_p0), 48, %s2184_s28 }
  0x35   : > { %s1685_s2 = sshll.u32 (%p98_p0), %s320_s16, 6 }
  0x36   : > { %s322_s15 = scalar_lea.vmem (%p98_p0), [#allocation7], %s1685_s2 }
  0x39   : > { %s333_s17 = sadd.s32 %s2048_s19, %s330_s14 }
  0x3a   : > { %s1689_s20 = sshll.u32 %s333_s17, 2 }
  0x3b   : > { %s2320_s18 = scalar_lea.vmem %s2629_s3, %s1689_s20 }
  0x3c   : > { %v352_v0 = vld [vmem:[%s2320_s18] sm:$0xf]  ;;  %v354_v1 = vld [vmem:[%s2320_s18 + $0xc] sm:$0xf]  ;;  %v356_v2 = vld [vmem:[%s2320_s18 + $0x18] sm:$0xf] }
  0x3d   : > { %353 = vst [vmem:[%s322_s15] sm:$0xf] %v352_v0  ;;  %355 = vst [vmem:[%s322_s15 + $0x4] sm:$0xf] %v354_v1  ;;  %v358_v3 = vld [vmem:[%s2320_s18 + $0x24] sm:$0xf] }
  0x3e   : > { %357 = vst [vmem:[%s322_s15 + $0x8] sm:$0xf] %v356_v2  ;;  %v360_v4 = vld [vmem:[%s2320_s18 + $0x30] sm:$0xf]  ;;  %v362_v5 = vld [vmem:[%s2320_s18 + $0x3c] sm:$0xf] }
  0x3f   : > { %359 = vst [vmem:[%s322_s15 + $0xc] sm:$0xf] %v358_v3  ;;  %361 = vst [vmem:[%s322_s15 + $0x10] sm:$0xf] %v360_v4  ;;  %v364_v6 = vld [vmem:[%s2320_s18 + $0x48] sm:$0xf] }
  0x40   : > { %363 = vst [vmem:[%s322_s15 + $0x14] sm:$0xf] %v362_v5  ;;  %v366_v7 = vld [vmem:[%s2320_s18 + $0x54] sm:$0xf]  ;;  %v368_v8 = vld [vmem:[%s2320_s18 + $0x60] sm:$0xf] }
  0x41   : > { %365 = vst [vmem:[%s322_s15 + $0x18] sm:$0xf] %v364_v6  ;;  %367 = vst [vmem:[%s322_s15 + $0x1c] sm:$0xf] %v366_v7  ;;  %v370_v9 = vld [vmem:[%s2320_s18 + $0x6c] sm:$0xf] }
  0x42   : > { %369 = vst [vmem:[%s322_s15 + $0x20] sm:$0xf] %v368_v8  ;;  %v372_v10 = vld [vmem:[%s2320_s18 + $0x78] sm:$0xf]  ;;  %v374_v11 = vld [vmem:[%s2320_s18 + $0x84] sm:$0xf] }
  0x43   : > { %371 = vst [vmem:[%s322_s15 + $0x24] sm:$0xf] %v370_v9  ;;  %373 = vst [vmem:[%s322_s15 + $0x28] sm:$0xf] %v372_v10  ;;  %v376_v12 = vld [vmem:[%s2320_s18 + $0x90] sm:$0xf] }
  0x44   : > { %375 = vst [vmem:[%s322_s15 + $0x2c] sm:$0xf] %v374_v11  ;;  %v378_v13 = vld [vmem:[%s2320_s18 + $0x9c] sm:$0xf]  ;;  %v380_v14 = vld [vmem:[%s2320_s18 + $0xa8] sm:$0xf] }
  0x45   : > { %377 = vst [vmem:[%s322_s15 + $0x30] sm:$0xf] %v376_v12  ;;  %379 = vst [vmem:[%s322_s15 + $0x34] sm:$0xf] %v378_v13  ;;  %v382_v15 = vld [vmem:[%s2320_s18 + $0xb4] sm:$0xf] }
  0x46   : > { %381 = vst [vmem:[%s322_s15 + $0x38] sm:$0xf] %v380_v14  ;;  %383 = vst [vmem:[%s322_s15 + $0x3c] sm:$0xf] %v382_v15 }
  0x47 PF: > { %p1690_p3 = scmp.ge.s32.totalorder %s2188_s29, 1  ;;  %p472_p4 = scmp.lt.s32.totalorder %s2188_s29, 10 }
  0x49   : > { %p473_p5 = pnand %p1690_p3, %p472_p4 }
  0x4a   : > { %s479_s2 = sand.u32 (!%p473_p5), 1, %s2164_s23   ;;  %s539_s30 = sshra.s32 (!%p473_p5), %s2172_s25, 7 }
  0x4b   : > { %476 = sbr.rel (%p473_p5) target bundleno = 1029 (0x405), region = 89  ;;  %s1691_s0 = sshll.u32 (!%p473_p5), %s479_s2, 6 }
  0x4c   : > { %s541_s1 = sadd.s32 (!%p473_p5), %s2176_s26, %s539_s30  ;;  %s544_s11 = sand.u32 (!%p473_p5), 127, %s2172_s25 }
  0x4d   : > { %s1692_s22 = sshll.u32 (!%p473_p5), %s541_s1, 7  ;;  %s1695_s12 = sshll.u32 (!%p473_p5), %s2176_s26, 4 }
  0x4e   : > { %s545_s14 = sadd.s32 (!%p473_p5), %s1692_s22, %s544_s11  ;;  %p562_p6 = scmp.lt.s32.totalorder (!%p473_p5), %s1695_s12, 47 }
  0x4f   : > { %s546_s16 = sld [smem:[#allocation4 + %s545_s14]] (!%p473_p5)  ;;  %p1699_p8 = scmp.ne.s32.totalorder (!%p473_p5), %s2172_s25, 0 }
  0x50   : > { %s2658_s12 = smov (!%p562_p6, %s1695_s12), 47 }
  0x51   : > { %s1696_s19 = sshll.u32 %s2658_s12, 3  ;;  %s2360_s12 = scalar_lea.vmem [#allocation7], %s1691_s0 }
  0x52   : > { %s2348_s21 = scalar_lea.vmem %s2631_s5, %s1696_s19  ;;  %s2353_s23 = scalar_lea.vmem %s2636_s10, %s1696_s19 }
  0x55   : > { %s1693_s2 = sshll.u32 %s546_s16, 4 }
  0x56   : > { %p548_p7 = scmp.lt.s32.totalorder %s1693_s2, 47  ;;  %576 = sbr.rel (%p1699_p8) target bundleno = 100 (0x64), region = 97 }
  0x58   : > { %s2660_s2 = smov (!%p548_p7, %s1693_s2), 47 }
  0x59   : > { %s1694_s30 = sshll.u32 %s2660_s2, 3 }
  0x5a   : > { %s2358_s11 = scalar_lea.vmem %s2630_s4, %s1694_s30 }
  0x5b   : > { %vm577_vm0 = vcmask 64512   ;;  %v2192_v16 = vmov 0.0  }
  0x5c   : > { %578 = vst.msk [vmem:[#allocation2] sm:$0xff] %vm577_vm0, %v2192_v16  ;;  %579 = vst.msk [vmem:[#allocation2 + $0x8] sm:$0xff] %vm577_vm0, %v2192_v16 }
  0x5d   : > { %580 = vst.msk [vmem:[#allocation2 + $0x10] sm:$0xff] %vm577_vm0, %v2192_v16  ;;  %581 = vst.msk [vmem:[#allocation2 + $0x18] sm:$0xff] %vm577_vm0, %v2192_v16 }
  0x5e   : > { %582 = vst.msk [vmem:[#allocation2 + $0x20] sm:$0xff] %vm577_vm0, %v2192_v16  ;;  %583 = vst.msk [vmem:[#allocation2 + $0x28] sm:$0xff] %vm577_vm0, %v2192_v16 }
  0x5f   : > { %584 = vst.msk [vmem:[#allocation2 + $0x30] sm:$0xff] %vm577_vm0, %v2192_v16  ;;  %585 = vst.msk [vmem:[#allocation2 + $0x38] sm:$0xff] %vm577_vm0, %v2192_v16 }
  0x60   : > { %586 = vst.msk [vmem:[#allocation2 + $0x40] sm:$0xff] %vm577_vm0, %v2192_v16  ;;  %587 = vst.msk [vmem:[#allocation2 + $0x48] sm:$0xff] %vm577_vm0, %v2192_v16 }
  0x61   : > { %588 = vst.msk [vmem:[#allocation2 + $0x50] sm:$0xff] %vm577_vm0, %v2192_v16  ;;  %589 = vst.msk [vmem:[#allocation2 + $0x58] sm:$0xff] %vm577_vm0, %v2192_v16 }
  0x62   : > { %590 = vst.msk [vmem:[#allocation2 + $0x60] sm:$0xff] %vm577_vm0, %v2192_v16  ;;  %591 = vst.msk [vmem:[#allocation2 + $0x68] sm:$0xff] %vm577_vm0, %v2192_v16 }
  0x63   : > { %592 = vst.msk [vmem:[#allocation2 + $0x70] sm:$0xff] %vm577_vm0, %v2192_v16  ;;  %593 = vst.msk [vmem:[#allocation2 + $0x78] sm:$0xff] %vm577_vm0, %v2192_v16 }
  0x64 PF: > { %s594_s0 = sld [smem:[#allocation5 + %s2176_s26]] }
  0x6a   : > { %p1700_p9 = scmp.ge.s32.totalorder %s2172_s25, %s594_s0 }
  0x6c   : > { %598 = sbr.rel (%p1700_p9) target bundleno = 585 (0x249), region = 101 }
  0x71   : > { %v616_v17 = vld [vmem:[%s2632_s6 + $0x8] sm:$0xff]  ;;  %v615_v18 = vld [vmem:[%s2632_s6] sm:$0xff]  ;;  %vm617_vm1 = vcmask 130048   ;;  %v601_v21 = vld [vmem:[%s2358_s11 + $0x10] sm:$0xff]  ;;  %vm1020_vm2 = vcmask 64512  }
  0x72   : > { %v599_v19 = vld [vmem:[%s2358_s11] sm:$0xff]  ;;  %1878 = vmatprep.subr.mxu0 %v616_v17  ;;  %v600_v20 = vld [vmem:[%s2358_s11 + $0x8] sm:$0xff]  ;;  %v602_v22 = vld [vmem:[%s2358_s11 + $0x18] sm:$0xff] }
  0x73   : > { %1882 = vmatprep.mubr.msk.f32.mxu0 %vm617_vm1, %v599_v19  ;;  %1879 = vmatpush3.msra.mxu0 %v616_v17  ;;  %v603_v23 = vld [vmem:[%s2358_s11 + $0x20] sm:$0xff]  ;;  %v604_v24 = vld [vmem:[%s2358_s11 + $0x28] sm:$0xff]  ;;  %v605_v25 = vld [vmem:[%s2358_s11 + $0x30] sm:$0xff] }
  0x74   : > { %1880 = vmatprep.subr.mxu0 %v615_v18  ;;  %v606_v26 = vld [vmem:[%s2358_s11 + $0x38] sm:$0xff]  ;;  %v607_v27 = vld [vmem:[%s2358_s11 + $0x40] sm:$0xff]  ;;  %v608_v28 = vld [vmem:[%s2358_s11 + $0x48] sm:$0xff] }
  0x75   : > { %1881 = vmatpush3.msra.mxu0 %v615_v18  ;;  %v609_v29 = vld [vmem:[%s2358_s11 + $0x50] sm:$0xff]  ;;  %v610_v30 = vld [vmem:[%s2358_s11 + $0x58] sm:$0xff]  ;;  %v611_v31 = vld [vmem:[%s2358_s11 + $0x60] sm:$0xff] }
  0x76   : > { %1883 = vmatmul.mubr.msk.f32.vlgmr.msra.gmra.mxu0 %vm617_vm1, %v600_v20  ;;  %v612_v32 = vld [vmem:[%s2358_s11 + $0x68] sm:$0xff]  ;;  %v613_v33 = vld [vmem:[%s2358_s11 + $0x70] sm:$0xff]  ;;  %v614_v34 = vld [vmem:[%s2358_s11 + $0x78] sm:$0xff] }
  0x77   : > { %1885 = vmatprep.mubr.msk.f32.mxu0 %vm617_vm1, %v601_v21  ;;  %v2420_v35 = vld [vmem:[%s2360_s12 + $0x18] sm:$0xff]   ;;  %v2424_v37 = vld [vmem:[%s2360_s12] sm:$0xff]   ;;  %v1786_v56 = vld [vmem:[%s2360_s12 + $0x8] sm:$0xff]  }
  0x78   : > { %v1768_v36 = vunpack.c.l.bf16 %v2420_v35  ;;  %v1756_v38 = vunpack.c.l.bf16 %v2424_v37  ;;  %v1789_v55 = vld [vmem:[%s2360_s12 + $0x20] sm:$0xff]   ;;  %v1769_v57 = vunpack.c.h.bf16 %v2420_v35  ;;  %v1757_v58 = vunpack.c.h.bf16 %v2424_v37  ;;  %v1790_v61 = vld [vmem:[%s2360_s12 + $0x28] sm:$0xff]   ;;  %v1787_v62 = vld [vmem:[%s2360_s12 + $0x10] sm:$0xff]  }
  0x79   : > { %v1772_v59 = vunpack.c.l.bf16 %v1789_v55  ;;  %v1760_v60 = vunpack.c.l.bf16 %v1786_v56  ;;  %v1773_v63 = vunpack.c.h.bf16 %v1789_v55  ;;  %v1761_v0 = vunpack.c.h.bf16 %v1786_v56  ;;  %v1791_v3 = vld [vmem:[%s2360_s12 + $0x30] sm:$0xff]   ;;  %v1792_v7 = vld [vmem:[%s2360_s12 + $0x38] sm:$0xff]   ;;  %v844_v12 = vld [vmem:[#allocation2 + $0x8] sm:$0xff] }
  0x7a   : > { %1886 = vmatmul.mubr.msk.f32.gmra.mxu0 %vm617_vm1, %v602_v22  ;;  %1947 = vmatprep.mubr.f32.mxu1 %v1768_v36  ;;  %v1776_v1 = vunpack.c.l.bf16 %v1790_v61  ;;  %v1764_v2 = vunpack.c.l.bf16 %v1787_v62  ;;  %v1777_v4 = vunpack.c.h.bf16 %v1790_v61  ;;  %v1765_v5 = vunpack.c.h.bf16 %v1787_v62  ;;  %v850_v11 = vld [vmem:[#allocation2 + $0x38] sm:$0xff]  ;;  %v849_v14 = vld [vmem:[#allocation2 + $0x30] sm:$0xff]  ;;  %v843_v16 = vld [vmem:[#allocation2] sm:$0xff] }
  0x7b   : > { %1888 = vmatprep.mubr.msk.f32.mxu0 %vm617_vm1, %v603_v23  ;;  %v1780_v6 = vunpack.c.l.bf16 %v1791_v3  ;;  %v1781_v8 = vunpack.c.h.bf16 %v1791_v3  ;;  %v1784_v9 = vunpack.c.l.bf16 %v1792_v7  ;;  %v1785_v10 = vunpack.c.h.bf16 %v1792_v7  ;;  %v852_v20 = vld [vmem:[#allocation2 + $0x48] sm:$0xff]  ;;  %v846_v22 = vld [vmem:[#allocation2 + $0x18] sm:$0xff]  ;;  %v857_v55 = vld [vmem:[#allocation2 + $0x70] sm:$0xff] }
  0x7e   : > { %1889 = vmatmul.mubr.msk.f32.gmra.mxu0 %vm617_vm1, %v604_v24 }
  0x7f   : > { %1891 = vmatprep.mubr.msk.f32.mxu0 %vm617_vm1, %v605_v25 }
  0x82   : > { %1892 = vmatmul.mubr.msk.f32.gmra.mxu0 %vm617_vm1, %v606_v26  ;;  %v851_v26 = vld [vmem:[#allocation2 + $0x40] sm:$0xff] }
  0x83   : > { %1894 = vmatprep.mubr.msk.f32.mxu0 %vm617_vm1, %v607_v27 }
  0x86   : > { %1895 = vmatmul.mubr.msk.f32.gmra.mxu0 %vm617_vm1, %v608_v28  ;;  %v845_v28 = vld [vmem:[#allocation2 + $0x10] sm:$0xff] }
  0x87   : > { %1897 = vmatprep.mubr.msk.f32.mxu0 %vm617_vm1, %v609_v29 }
  0x8a   : > { %1898 = vmatmul.mubr.msk.f32.gmra.mxu0 %vm617_vm1, %v610_v30 }
  0x8b   : > { %1900 = vmatprep.mubr.msk.f32.mxu0 %vm617_vm1, %v611_v31 }
  0x8e   : > { %1901 = vmatmul.mubr.msk.f32.gmra.mxu0 %vm617_vm1, %v612_v32  ;;  %v854_v32 = vld [vmem:[#allocation2 + $0x58] sm:$0xff] }
  0x8f   : > { %1903 = vmatprep.mubr.msk.f32.mxu0 %vm617_vm1, %v613_v33 }
  0x92   : > { %1904 = vmatmul.mubr.msk.f32.gmra.mxu0 %vm617_vm1, %v614_v34  ;;  %v848_v34 = vld [vmem:[#allocation2 + $0x28] sm:$0xff] }
  0x93   : > { %1938 = vmatprep.mubr.f32.mxu0 %v1756_v38  ;;  %v853_v38 = vld [vmem:[#allocation2 + $0x50] sm:$0xff] }
 0x136   : > { %v2427_v39 = vpop.f32.mrf.mxu0 }
 0x138   : > { %v2429_v40 = vpop.f32.mrf.mxu0 }
 0x13a   : > { %v2431_v41 = vpop.f32.mrf.mxu0 }
 0x13c   : > { %v2433_v42 = vpop.f32.mrf.mxu0 }
 0x13e   : > { %v1890_v43 = vpop.f32.mrf.mxu0 }
 0x140   : > { %v752_v44 = vpop.f32.mrf.mxu0 }
 0x142   : > { %v1893_v45 = vpop.f32.mrf.mxu0 }
 0x144   : > { %v762_v46 = vpop.f32.mrf.mxu0 }
 0x146   : > { %v1896_v47 = vpop.f32.mrf.mxu0 }
 0x148   : > { %v772_v48 = vpop.f32.mrf.mxu0 }
 0x14a   : > { %v1899_v49 = vpop.f32.mrf.mxu0 }
 0x14c   : > { %v782_v50 = vpop.f32.mrf.mxu0 }
 0x14e   : > { %v1902_v51 = vpop.f32.mrf.mxu0 }
 0x150   : > { %v792_v52 = vpop.f32.mrf.mxu0 }
 0x152   : > { %v1905_v53 = vpop.f32.mrf.mxu0 }
 0x153   : > { %1906 = vmatprep.subr.mxu0 %v1905_v53  ;;  %2016 = vmatprep.subr.mxu1 %v1905_v53 }
 0x154   : > { %v802_v54 = vpop.f32.mrf.mxu0  ;;  %1907 = vmatpush3.msra.mxu0 %v1905_v53  ;;  %2032 = vmatpush3.msra.mxu1 %v1905_v53 }
 0x155   : > { %1908 = vmatprep.subr.mxu0 %v802_v54  ;;  %2017 = vmatprep.subr.mxu1 %v802_v54 }
 0x156   : > { %1909 = vmatpush3.msra.mxu0 %v802_v54  ;;  %2033 = vmatpush3.msra.mxu1 %v802_v54 }
 0x157   : > { %1910 = vmatprep.subr.mxu0 %v1902_v51  ;;  %2018 = vmatprep.subr.mxu1 %v1902_v51 }
 0x158   : > { %1911 = vmatpush3.msra.mxu0 %v1902_v51  ;;  %2034 = vmatpush3.msra.mxu1 %v1902_v51 }
 0x159   : > { %1912 = vmatprep.subr.mxu0 %v792_v52  ;;  %2019 = vmatprep.subr.mxu1 %v792_v52 }
 0x15a   : > { %1913 = vmatpush3.msra.mxu0 %v792_v52  ;;  %2035 = vmatpush3.msra.mxu1 %v792_v52  ;;  %v858_v52 = vld [vmem:[#allocation2 + $0x78] sm:$0xff] }
 0x15b   : > { %1914 = vmatprep.subr.mxu0 %v1899_v49  ;;  %2020 = vmatprep.subr.mxu1 %v1899_v49 }
 0x15c   : > { %1915 = vmatpush3.msra.mxu0 %v1899_v49  ;;  %2036 = vmatpush3.msra.mxu1 %v1899_v49  ;;  %v855_v49 = vld [vmem:[#allocation2 + $0x60] sm:$0xff] }
 0x15d   : > { %1916 = vmatprep.subr.mxu0 %v782_v50  ;;  %2021 = vmatprep.subr.mxu1 %v782_v50 }
 0x15e   : > { %1917 = vmatpush3.msra.mxu0 %v782_v50  ;;  %2037 = vmatpush3.msra.mxu1 %v782_v50 }
 0x15f   : > { %1918 = vmatprep.subr.mxu0 %v1896_v47  ;;  %2022 = vmatprep.subr.mxu1 %v1896_v47 }
 0x160   : > { %1919 = vmatpush3.msra.mxu0 %v1896_v47  ;;  %2038 = vmatpush3.msra.mxu1 %v1896_v47 }
 0x161   : > { %1920 = vmatprep.subr.mxu0 %v772_v48  ;;  %2023 = vmatprep.subr.mxu1 %v772_v48 }
 0x162   : > { %1921 = vmatpush3.msra.mxu0 %v772_v48  ;;  %2039 = vmatpush3.msra.mxu1 %v772_v48 }
 0x163   : > { %1922 = vmatprep.subr.mxu0 %v1893_v45  ;;  %2024 = vmatprep.subr.mxu1 %v1893_v45 }
 0x164   : > { %1923 = vmatpush3.msra.mxu0 %v1893_v45  ;;  %2040 = vmatpush3.msra.mxu1 %v1893_v45 }
 0x165   : > { %1924 = vmatprep.subr.mxu0 %v762_v46  ;;  %2025 = vmatprep.subr.mxu1 %v762_v46 }
 0x166   : > { %1925 = vmatpush3.msra.mxu0 %v762_v46  ;;  %2041 = vmatpush3.msra.mxu1 %v762_v46 }
 0x167   : > { %1926 = vmatprep.subr.mxu0 %v1890_v43  ;;  %2026 = vmatprep.subr.mxu1 %v1890_v43 }
 0x168   : > { %1927 = vmatpush3.msra.mxu0 %v1890_v43  ;;  %2042 = vmatpush3.msra.mxu1 %v1890_v43 }
 0x169   : > { %1928 = vmatprep.subr.mxu0 %v752_v44  ;;  %2027 = vmatprep.subr.mxu1 %v752_v44 }
 0x16a   : > { %1929 = vmatpush3.msra.mxu0 %v752_v44  ;;  %2043 = vmatpush3.msra.mxu1 %v752_v44  ;;  %v856_v44 = vld [vmem:[#allocation2 + $0x68] sm:$0xff] }
 0x16b   : > { %1930 = vmatprep.subr.mxu0 %v2431_v41  ;;  %2028 = vmatprep.subr.mxu1 %v2431_v41 }
 0x16c   : > { %1931 = vmatpush3.msra.mxu0 %v2431_v41  ;;  %2044 = vmatpush3.msra.mxu1 %v2431_v41 }
 0x16d   : > { %1932 = vmatprep.subr.mxu0 %v2433_v42  ;;  %2029 = vmatprep.subr.mxu1 %v2433_v42 }
 0x16e   : > { %1933 = vmatpush3.msra.mxu0 %v2433_v42  ;;  %2045 = vmatpush3.msra.mxu1 %v2433_v42 }
 0x16f   : > { %1934 = vmatprep.subr.mxu0 %v2427_v39  ;;  %2030 = vmatprep.subr.mxu1 %v2427_v39 }
 0x170   : > { %1935 = vmatpush3.msra.mxu0 %v2427_v39  ;;  %2046 = vmatpush3.msra.mxu1 %v2427_v39 }
 0x171   : > { %1936 = vmatprep.subr.mxu0 %v2429_v40  ;;  %2031 = vmatprep.subr.mxu1 %v2429_v40 }
 0x172   : > { %1937 = vmatpush3.msra.mxu0 %v2429_v40  ;;  %2047 = vmatpush3.msra.mxu1 %v2429_v40  ;;  %v847_v40 = vld [vmem:[#allocation2 + $0x20] sm:$0xff] }
 0x173   : > { %1948 = vmatmul.mubr.f32.vlgmr.msra.gmra.mxu1 %v1769_v57  ;;  %1939 = vmatmul.mubr.f32.vlgmr.msra.gmra.mxu0 %v1757_v58 }
 0x174   : > { %1950 = vmatprep.mubr.f32.mxu1 %v1772_v59  ;;  %1941 = vmatprep.mubr.f32.mxu0 %v1760_v60 }
 0x177   : > { %1951 = vmatmul.mubr.f32.gmra.mxu1 %v1773_v63  ;;  %1942 = vmatmul.mubr.f32.gmra.mxu0 %v1761_v0 }
 0x178   : > { %1953 = vmatprep.mubr.f32.mxu1 %v1776_v1  ;;  %1944 = vmatprep.mubr.f32.mxu0 %v1764_v2 }
 0x17b   : > { %1954 = vmatmul.mubr.f32.gmra.mxu1 %v1777_v4  ;;  %1945 = vmatmul.mubr.f32.gmra.mxu0 %v1765_v5 }
 0x17c   : > { %1956 = vmatprep.mubr.f32.mxu1 %v1780_v6 }
 0x17f   : > { %1957 = vmatmul.mubr.f32.gmra.mxu1 %v1781_v8 }
 0x180   : > { %1959 = vmatprep.mubr.f32.mxu1 %v1784_v9 }
 0x183   : > { %1960 = vmatmul.mubr.f32.gmra.mxu1 %v1785_v10 }
 0x233   : > { %v1949_v13 = vpop.f32.mrf.mxu1  ;;  %v1940_v15 = vpop.f32.mrf.mxu0 }
 0x234   : > { %v1011_v17 = vadd.f32 %v1949_v13, %v850_v11  ;;  %v1005_v18 = vadd.f32 %v1940_v15, %v844_v12 }
 0x235   : > { %v955_v19 = vpop.f32.mrf.mxu1  ;;  %v925_v21 = vpop.f32.mrf.mxu0 }
 0x236   : > { %1028 = vst.msk [vmem:[#allocation2 + $0x38] sm:$0xff] %vm1020_vm2, %v1011_v17  ;;  %v1010_v23 = vadd.f32 %v955_v19, %v849_v14  ;;  %1022 = vst.msk [vmem:[#allocation2 + $0x8] sm:$0xff] %vm1020_vm2, %v1005_v18  ;;  %v1004_v24 = vadd.f32 %v925_v21, %v843_v16 }
 0x237   : > { %v1952_v25 = vpop.f32.mrf.mxu1  ;;  %v1943_v27 = vpop.f32.mrf.mxu0 }
 0x238   : > { %1027 = vst.msk [vmem:[#allocation2 + $0x30] sm:$0xff] %vm1020_vm2, %v1010_v23  ;;  %v1013_v29 = vadd.f32 %v1952_v25, %v852_v20  ;;  %1021 = vst.msk [vmem:[#allocation2] sm:$0xff] %vm1020_vm2, %v1004_v24  ;;  %v1007_v30 = vadd.f32 %v1943_v27, %v846_v22 }
 0x239   : > { %v965_v31 = vpop.f32.mrf.mxu1  ;;  %v935_v33 = vpop.f32.mrf.mxu0 }
 0x23a   : > { %1030 = vst.msk [vmem:[#allocation2 + $0x48] sm:$0xff] %vm1020_vm2, %v1013_v29  ;;  %v1012_v35 = vadd.f32 %v965_v31, %v851_v26  ;;  %1024 = vst.msk [vmem:[#allocation2 + $0x18] sm:$0xff] %vm1020_vm2, %v1007_v30  ;;  %v1006_v36 = vadd.f32 %v935_v33, %v845_v28 }
 0x23b   : > { %v1955_v37 = vpop.f32.mrf.mxu1  ;;  %v1946_v39 = vpop.f32.mrf.mxu0 }
 0x23c   : > { %1029 = vst.msk [vmem:[#allocation2 + $0x40] sm:$0xff] %vm1020_vm2, %v1012_v35  ;;  %v1015_v41 = vadd.f32 %v1955_v37, %v854_v32  ;;  %1023 = vst.msk [vmem:[#allocation2 + $0x10] sm:$0xff] %vm1020_vm2, %v1006_v36  ;;  %v1009_v42 = vadd.f32 %v1946_v39, %v848_v34 }
 0x23d   : > { %v975_v43 = vpop.f32.mrf.mxu1  ;;  %v945_v45 = vpop.f32.mrf.mxu0 }
 0x23e   : > { %1032 = vst.msk [vmem:[#allocation2 + $0x58] sm:$0xff] %vm1020_vm2, %v1015_v41  ;;  %v1014_v46 = vadd.f32 %v975_v43, %v853_v38  ;;  %1026 = vst.msk [vmem:[#allocation2 + $0x28] sm:$0xff] %vm1020_vm2, %v1009_v42  ;;  %v1008_v47 = vadd.f32 %v945_v45, %v847_v40 }
 0x23f   : > { %v1958_v48 = vpop.f32.mrf.mxu1 }
 0x240   : > { %1031 = vst.msk [vmem:[#allocation2 + $0x50] sm:$0xff] %vm1020_vm2, %v1014_v46  ;;  %v1017_v50 = vadd.f32 %v1958_v48, %v856_v44  ;;  %1025 = vst.msk [vmem:[#allocation2 + $0x20] sm:$0xff] %vm1020_vm2, %v1008_v47 }
 0x241   : > { %v985_v51 = vpop.f32.mrf.mxu1 }
 0x242   : > { %1034 = vst.msk [vmem:[#allocation2 + $0x68] sm:$0xff] %vm1020_vm2, %v1017_v50  ;;  %v1016_v53 = vadd.f32 %v985_v51, %v855_v49 }
 0x243   : > { %v1961_v54 = vpop.f32.mrf.mxu1 }
 0x244   : > { %1033 = vst.msk [vmem:[#allocation2 + $0x60] sm:$0xff] %vm1020_vm2, %v1016_v53  ;;  %v1019_v56 = vadd.f32 %v1961_v54, %v858_v52 }
 0x245   : > { %v995_v57 = vpop.f32.mrf.mxu1 }
 0x246   : > { %1036 = vst.msk [vmem:[#allocation2 + $0x78] sm:$0xff] %vm1020_vm2, %v1019_v56  ;;  %v1018_v58 = vadd.f32 %v995_v57, %v857_v55 }
 0x248   : > { %1035 = vst.msk [vmem:[#allocation2 + $0x70] sm:$0xff] %vm1020_vm2, %v1018_v58 }
 0x249 PF: > { %p1717_p10 = scmp.ne.s32.totalorder %s2172_s25, 2 }
 0x24a   : > { %s1253_s30 = sld [smem:[#allocation6]] (!%p1717_p10) }
 0x24b   : > { %1040 = sbr.rel (%p1717_p10) target bundleno = 1029 (0x405), region = 105 }
 0x250   : > { %v1058_v59 = vld [vmem:[%s2632_s6 + $0x8] sm:$0xff]  ;;  %v1057_v60 = vld [vmem:[%s2632_s6] sm:$0xff]  ;;  %vm1059_vm3 = vcmask 130048   ;;  %v1043_v63 = vld [vmem:[%s2348_s21 + $0x10] sm:$0xff]  ;;  %s1254_s1 = sadd.f32 1.0, %s1253_s30  ;;  %vm1351_vm4 = vcmask 64512  }
 0x251   : > { %v1041_v61 = vld [vmem:[%s2348_s21] sm:$0xff]  ;;  %1962 = vmatprep.subr.mxu0 %v1058_v59  ;;  %v1042_v62 = vld [vmem:[%s2348_s21 + $0x8] sm:$0xff]  ;;  %v1044_v0 = vld [vmem:[%s2348_s21 + $0x18] sm:$0xff] }
 0x252   : > { %1966 = vmatprep.mubr.msk.f32.mxu0 %vm1059_vm3, %v1041_v61  ;;  %1963 = vmatpush3.msra.mxu0 %v1058_v59  ;;  %v1045_v1 = vld [vmem:[%s2348_s21 + $0x20] sm:$0xff]  ;;  %v1046_v2 = vld [vmem:[%s2348_s21 + $0x28] sm:$0xff]  ;;  %v1047_v3 = vld [vmem:[%s2348_s21 + $0x30] sm:$0xff]  ;;  %v2517_v14 = vstv %s1254_s1 }
 0x253   : > { %1964 = vmatprep.subr.mxu0 %v1057_v60  ;;  %v1048_v4 = vld [vmem:[%s2348_s21 + $0x38] sm:$0xff]  ;;  %v1049_v5 = vld [vmem:[%s2348_s21 + $0x40] sm:$0xff]  ;;  %v1050_v6 = vld [vmem:[%s2348_s21 + $0x48] sm:$0xff] }
 0x254   : > { %1965 = vmatpush3.msra.mxu0 %v1057_v60  ;;  %v1051_v7 = vld [vmem:[%s2348_s21 + $0x50] sm:$0xff]  ;;  %v1052_v8 = vld [vmem:[%s2348_s21 + $0x58] sm:$0xff]  ;;  %v1053_v9 = vld [vmem:[%s2348_s21 + $0x60] sm:$0xff] }
 0x255   : > { %1967 = vmatmul.mubr.msk.f32.vlgmr.msra.gmra.mxu0 %vm1059_vm3, %v1042_v62  ;;  %v1054_v10 = vld [vmem:[%s2348_s21 + $0x68] sm:$0xff]  ;;  %v1055_v11 = vld [vmem:[%s2348_s21 + $0x70] sm:$0xff]  ;;  %v1056_v12 = vld [vmem:[%s2348_s21 + $0x78] sm:$0xff] }
 0x256   : > { %1969 = vmatprep.mubr.msk.f32.mxu0 %vm1059_vm3, %v1043_v63  ;;  %v1343_v13 = vld [vmem:[%s2634_s8] sm:$0xff]  ;;  %v1273_v16 = vld [vmem:[#allocation2 + $0x8] sm:$0xff]  ;;  %v1275_v24 = vld [vmem:[#allocation2 + $0x18] sm:$0xff] }
 0x257   : > { %1990 = vmatprep.subr.mxu1 %v1343_v13  ;;  %v1272_v19 = vld [vmem:[#allocation2] sm:$0xff]  ;;  %v1274_v29 = vld [vmem:[#allocation2 + $0x10] sm:$0xff]  ;;  %v1277_v34 = vld [vmem:[#allocation2 + $0x28] sm:$0xff] }
 0x258   : > { %1991 = vmatpush3.msra.mxu1 %v1343_v13  ;;  %v2523_v21 = vld [vmem:[%s2633_s7] ss:$0 sm:$0xff]  ;;  %v1279_v46 = vld [vmem:[#allocation2 + $0x38] sm:$0xff]  ;;  %v1278_v53 = vld [vmem:[#allocation2 + $0x30] sm:$0xff] }
 0x259   : > { %1970 = vmatmul.mubr.msk.f32.gmra.mxu0 %vm1059_vm3, %v1044_v0  ;;  %v1276_v41 = vld [vmem:[#allocation2 + $0x20] sm:$0xff]  ;;  %v1281_v58 = vld [vmem:[#allocation2 + $0x48] sm:$0xff]  ;;  %v1282_v13 = vld [vmem:[#allocation2 + $0x50] sm:$0xff] }
 0x25a   : > { %1972 = vmatprep.mubr.msk.f32.mxu0 %vm1059_vm3, %v1045_v1  ;;  %v1280_v1 = vld [vmem:[#allocation2 + $0x40] sm:$0xff] }
 0x25d   : > { %1973 = vmatmul.mubr.msk.f32.gmra.mxu0 %vm1059_vm3, %v1046_v2 }
 0x25e   : > { %1975 = vmatprep.mubr.msk.f32.mxu0 %vm1059_vm3, %v1047_v3 }
 0x261   : > { %1976 = vmatmul.mubr.msk.f32.gmra.mxu0 %vm1059_vm3, %v1048_v4 }
 0x262   : > { %1978 = vmatprep.mubr.msk.f32.mxu0 %vm1059_vm3, %v1049_v5 }
 0x265   : > { %1979 = vmatmul.mubr.msk.f32.gmra.mxu0 %vm1059_vm3, %v1050_v6  ;;  %v1283_v6 = vld [vmem:[#allocation2 + $0x58] sm:$0xff] }
 0x266   : > { %1981 = vmatprep.mubr.msk.f32.mxu0 %vm1059_vm3, %v1051_v7 }
 0x269   : > { %1982 = vmatmul.mubr.msk.f32.gmra.mxu0 %vm1059_vm3, %v1052_v8 }
 0x26a   : > { %1984 = vmatprep.mubr.msk.f32.mxu0 %vm1059_vm3, %v1053_v9 }
 0x26d   : > { %1985 = vmatmul.mubr.msk.f32.gmra.mxu0 %vm1059_vm3, %v1054_v10 }
 0x26e   : > { %1987 = vmatprep.mubr.msk.f32.mxu0 %vm1059_vm3, %v1055_v11 }
 0x271   : > { %1988 = vmatmul.mubr.msk.f32.gmra.mxu0 %vm1059_vm3, %v1056_v12 }
 0x315   : > { %v1968_v15 = vpop.f32.mrf.mxu0 }
 0x316   : > { %v1257_v17 = vmul.f32 %v1968_v15, %v2517_v14 }
 0x317   : > { %v1174_v18 = vpop.f32.mrf.mxu0 }
 0x318   : > { %v1289_v20 = vadd.f32 %v1273_v16, %v1257_v17  ;;  %v1256_v22 = vmul.f32 %v2517_v14, %v1174_v18 }
 0x319   : > { %v1971_v23 = vpop.f32.mrf.mxu0 }
 0x31a   : > { %v1288_v25 = vadd.f32 %v1272_v19, %v1256_v22  ;;  %v1259_v26 = vmul.f32 %v1971_v23, %v2517_v14  ;;  %v1312_v27 = vadd.f32 %v2523_v21, %v1289_v20  ;;  %v1285_v19 = vld [vmem:[#allocation2 + $0x68] sm:$0xff] }
 0x31b   : > { %v1184_v28 = vpop.f32.mrf.mxu0 }
 0x31c   : > { %v1291_v30 = vadd.f32 %v1275_v24, %v1259_v26  ;;  %v1258_v31 = vmul.f32 %v2517_v14, %v1184_v28  ;;  %v1311_v32 = vadd.f32 %v2523_v21, %v1288_v25  ;;  %v1328_v38 = vmax.f32 %v1312_v27, 0.0  ;;  %v1284_v27 = vld [vmem:[#allocation2 + $0x60] sm:$0xff] }
 0x31d   : > { %v1974_v33 = vpop.f32.mrf.mxu0 }
 0x31e   : > { %v1290_v35 = vadd.f32 %v1274_v29, %v1258_v31  ;;  %v1261_v36 = vmul.f32 %v1974_v33, %v2517_v14  ;;  %v1327_v37 = vmax.f32 %v1311_v32, 0.0  ;;  %v1314_v39 = vadd.f32 %v2523_v21, %v1291_v30  ;;  %v1287_v32 = vld [vmem:[#allocation2 + $0x78] sm:$0xff] }
 0x31f   : > { %v1194_v40 = vpop.f32.mrf.mxu0 }
 0x320   : > { %v1313_v42 = vadd.f32 %v2523_v21, %v1290_v35  ;;  %v1293_v43 = vadd.f32 %v1277_v34, %v1261_v36  ;;  %v1260_v44 = vmul.f32 %v2517_v14, %v1194_v40  ;;  %1992 = vmatprep.mubr.msk.f32.mxu1 %vm1351_vm4, %v1327_v37  ;;  %v1330_v50 = vmax.f32 %v1314_v39, 0.0  ;;  %v1286_v39 = vld [vmem:[#allocation2 + $0x70] sm:$0xff] }
 0x321   : > { %v1977_v45 = vpop.f32.mrf.mxu0  ;;  %1993 = vmatmul.mubr.msk.f32.vlgmr.msra.gmra.mxu1 %vm1351_vm4, %v1328_v38 }
 0x322   : > { %v1329_v47 = vmax.f32 %v1313_v42, 0.0  ;;  %v1292_v48 = vadd.f32 %v1276_v41, %v1260_v44  ;;  %v1263_v49 = vmul.f32 %v1977_v45, %v2517_v14  ;;  %v1316_v51 = vadd.f32 %v2523_v21, %v1293_v43 }
 0x323   : > { %v1204_v52 = vpop.f32.mrf.mxu0 }
 0x324   : > { %v1315_v54 = vadd.f32 %v2523_v21, %v1292_v48  ;;  %v1295_v55 = vadd.f32 %v1279_v46, %v1263_v49  ;;  %v1262_v56 = vmul.f32 %v2517_v14, %v1204_v52  ;;  %1995 = vmatprep.mubr.msk.f32.mxu1 %vm1351_vm4, %v1329_v47  ;;  %v1332_v62 = vmax.f32 %v1316_v51, 0.0 }
 0x325   : > { %v1980_v57 = vpop.f32.mrf.mxu0  ;;  %1996 = vmatmul.mubr.msk.f32.gmra.mxu1 %vm1351_vm4, %v1330_v50 }
 0x326   : > { %v1331_v59 = vmax.f32 %v1315_v54, 0.0  ;;  %v1294_v60 = vadd.f32 %v1278_v53, %v1262_v56  ;;  %v1265_v61 = vmul.f32 %v1980_v57, %v2517_v14  ;;  %v1318_v63 = vadd.f32 %v2523_v21, %v1295_v55 }
 0x327   : > { %v1214_v0 = vpop.f32.mrf.mxu0 }
 0x328   : > { %v1317_v2 = vadd.f32 %v2523_v21, %v1294_v60  ;;  %v1297_v3 = vadd.f32 %v1281_v58, %v1265_v61  ;;  %v1264_v4 = vmul.f32 %v2517_v14, %v1214_v0  ;;  %1998 = vmatprep.mubr.msk.f32.mxu1 %vm1351_vm4, %v1331_v59  ;;  %v1334_v10 = vmax.f32 %v1318_v63, 0.0 }
 0x329   : > { %v1983_v5 = vpop.f32.mrf.mxu0  ;;  %1999 = vmatmul.mubr.msk.f32.gmra.mxu1 %vm1351_vm4, %v1332_v62 }
 0x32a   : > { %v1333_v7 = vmax.f32 %v1317_v2, 0.0  ;;  %v1296_v8 = vadd.f32 %v1280_v1, %v1264_v4  ;;  %v1267_v9 = vmul.f32 %v1983_v5, %v2517_v14  ;;  %v1320_v11 = vadd.f32 %v2523_v21, %v1297_v3 }
 0x32b   : > { %v1224_v12 = vpop.f32.mrf.mxu0 }
 0x32c   : > { %v1319_v15 = vadd.f32 %v2523_v21, %v1296_v8  ;;  %v1299_v16 = vadd.f32 %v1283_v6, %v1267_v9  ;;  %v1266_v17 = vmul.f32 %v2517_v14, %v1224_v12  ;;  %2001 = vmatprep.mubr.msk.f32.mxu1 %vm1351_vm4, %v1333_v7  ;;  %v1336_v24 = vmax.f32 %v1320_v11, 0.0 }
 0x32d   : > { %v1986_v18 = vpop.f32.mrf.mxu0  ;;  %2002 = vmatmul.mubr.msk.f32.gmra.mxu1 %vm1351_vm4, %v1334_v10 }
 0x32e   : > { %v1335_v20 = vmax.f32 %v1319_v15, 0.0  ;;  %v1298_v22 = vadd.f32 %v1282_v13, %v1266_v17  ;;  %v1269_v23 = vmul.f32 %v1986_v18, %v2517_v14  ;;  %v1322_v25 = vadd.f32 %v2523_v21, %v1299_v16 }
 0x32f   : > { %v1234_v26 = vpop.f32.mrf.mxu0 }
 0x330   : > { %v1321_v28 = vadd.f32 %v2523_v21, %v1298_v22  ;;  %v1301_v29 = vadd.f32 %v1285_v19, %v1269_v23  ;;  %v1268_v30 = vmul.f32 %v2517_v14, %v1234_v26  ;;  %2004 = vmatprep.mubr.msk.f32.mxu1 %vm1351_vm4, %v1335_v20  ;;  %v1338_v36 = vmax.f32 %v1322_v25, 0.0 }
 0x331   : > { %v1989_v31 = vpop.f32.mrf.mxu0  ;;  %2005 = vmatmul.mubr.msk.f32.gmra.mxu1 %vm1351_vm4, %v1336_v24 }
 0x332   : > { %v1337_v33 = vmax.f32 %v1321_v28, 0.0  ;;  %v1300_v34 = vadd.f32 %v1284_v27, %v1268_v30  ;;  %v1271_v35 = vmul.f32 %v1989_v31, %v2517_v14  ;;  %v1324_v37 = vadd.f32 %v2523_v21, %v1301_v29 }
 0x333   : > { %v1244_v38 = vpop.f32.mrf.mxu0 }
 0x334   : > { %v1323_v40 = vadd.f32 %v2523_v21, %v1300_v34  ;;  %v1303_v41 = vadd.f32 %v1287_v32, %v1271_v35  ;;  %v1270_v42 = vmul.f32 %v2517_v14, %v1244_v38  ;;  %2007 = vmatprep.mubr.msk.f32.mxu1 %vm1351_vm4, %v1337_v33  ;;  %v1340_v45 = vmax.f32 %v1324_v37, 0.0  ;;  %v1735_v14 = vld [vmem:[%s2635_s9] ss:$0 sm:$0xff] }
 0x335   : > { %2008 = vmatmul.mubr.msk.f32.gmra.mxu1 %vm1351_vm4, %v1338_v36 }
 0x336   : > { %v1339_v43 = vmax.f32 %v1323_v40, 0.0  ;;  %v1302_v44 = vadd.f32 %v1286_v39, %v1270_v42  ;;  %v1326_v46 = vadd.f32 %v2523_v21, %v1303_v41 }
 0x338   : > { %v1325_v47 = vadd.f32 %v2523_v21, %v1302_v44  ;;  %2010 = vmatprep.mubr.msk.f32.mxu1 %vm1351_vm4, %v1339_v43  ;;  %v1342_v49 = vmax.f32 %v1326_v46, 0.0 }
 0x339   : > { %2011 = vmatmul.mubr.msk.f32.gmra.mxu1 %vm1351_vm4, %v1340_v45 }
 0x33a   : > { %v1341_v48 = vmax.f32 %v1325_v47, 0.0 }
 0x33c   : > { %2013 = vmatprep.mubr.msk.f32.mxu1 %vm1351_vm4, %v1341_v48 }
 0x33d   : > { %2014 = vmatmul.mubr.msk.f32.gmra.mxu1 %vm1351_vm4, %v1342_v49 }
 0x3e1   : > { %v1994_v50 = vpop.f32.mrf.mxu1 }
 0x3e2   : > { %v1472_v51 = vadd.f32 %v1994_v50, %v1735_v14 }
 0x3e3   : > { %v1466_v52 = vpop.f32.mrf.mxu1 }
 0x3e4   : > { %v1546_v21 = vmax.f32 %v1472_v51, 0.0  ;;  %v1467_v53 = vadd.f32 %v1735_v14, %v1466_v52 }
 0x3e5   : > { %v1997_v54 = vpop.f32.mrf.mxu1 }
 0x3e6   : > { %1562 = vst.msk [vmem:[%s2353_s23 + $0x8] sm:$0xff] %vm1351_vm4, %v1546_v21  ;;  %v1545_v55 = vmax.f32 %v1467_v53, 0.0  ;;  %v1482_v56 = vadd.f32 %v1997_v54, %v1735_v14 }
 0x3e7   : > { %v1476_v57 = vpop.f32.mrf.mxu1 }
 0x3e8   : > { %1561 = vst.msk [vmem:[%s2353_s23] sm:$0xff] %vm1351_vm4, %v1545_v55  ;;  %v1548_v58 = vmax.f32 %v1482_v56, 0.0  ;;  %v1477_v59 = vadd.f32 %v1735_v14, %v1476_v57 }
 0x3e9   : > { %v2000_v60 = vpop.f32.mrf.mxu1 }
 0x3ea   : > { %1564 = vst.msk [vmem:[%s2353_s23 + $0x18] sm:$0xff] %vm1351_vm4, %v1548_v58  ;;  %v1547_v61 = vmax.f32 %v1477_v59, 0.0  ;;  %v1492_v62 = vadd.f32 %v2000_v60, %v1735_v14 }
 0x3eb   : > { %v1486_v63 = vpop.f32.mrf.mxu1 }
 0x3ec   : > { %1563 = vst.msk [vmem:[%s2353_s23 + $0x10] sm:$0xff] %vm1351_vm4, %v1547_v61  ;;  %v1550_v0 = vmax.f32 %v1492_v62, 0.0  ;;  %v1487_v1 = vadd.f32 %v1735_v14, %v1486_v63 }
 0x3ed   : > { %v2003_v2 = vpop.f32.mrf.mxu1 }
 0x3ee   : > { %1566 = vst.msk [vmem:[%s2353_s23 + $0x28] sm:$0xff] %vm1351_vm4, %v1550_v0  ;;  %v1549_v3 = vmax.f32 %v1487_v1, 0.0  ;;  %v1502_v4 = vadd.f32 %v2003_v2, %v1735_v14 }
 0x3ef   : > { %v1496_v5 = vpop.f32.mrf.mxu1 }
 0x3f0   : > { %1565 = vst.msk [vmem:[%s2353_s23 + $0x20] sm:$0xff] %vm1351_vm4, %v1549_v3  ;;  %v1552_v6 = vmax.f32 %v1502_v4, 0.0  ;;  %v1497_v7 = vadd.f32 %v1735_v14, %v1496_v5 }
 0x3f1   : > { %v2006_v8 = vpop.f32.mrf.mxu1 }
 0x3f2   : > { %1568 = vst.msk [vmem:[%s2353_s23 + $0x38] sm:$0xff] %vm1351_vm4, %v1552_v6  ;;  %v1551_v9 = vmax.f32 %v1497_v7, 0.0  ;;  %v1512_v10 = vadd.f32 %v2006_v8, %v1735_v14 }
 0x3f3   : > { %v1506_v11 = vpop.f32.mrf.mxu1 }
 0x3f4   : > { %1567 = vst.msk [vmem:[%s2353_s23 + $0x30] sm:$0xff] %vm1351_vm4, %v1551_v9  ;;  %v1554_v12 = vmax.f32 %v1512_v10, 0.0  ;;  %v1507_v13 = vadd.f32 %v1735_v14, %v1506_v11 }
 0x3f5   : > { %v2009_v15 = vpop.f32.mrf.mxu1 }
 0x3f6   : > { %1570 = vst.msk [vmem:[%s2353_s23 + $0x48] sm:$0xff] %vm1351_vm4, %v1554_v12  ;;  %v1553_v16 = vmax.f32 %v1507_v13, 0.0  ;;  %v1522_v17 = vadd.f32 %v2009_v15, %v1735_v14 }
 0x3f7   : > { %v1516_v18 = vpop.f32.mrf.mxu1 }
 0x3f8   : > { %1569 = vst.msk [vmem:[%s2353_s23 + $0x40] sm:$0xff] %vm1351_vm4, %v1553_v16  ;;  %v1556_v19 = vmax.f32 %v1522_v17, 0.0  ;;  %v1517_v20 = vadd.f32 %v1735_v14, %v1516_v18 }
 0x3f9   : > { %v2012_v22 = vpop.f32.mrf.mxu1 }
 0x3fa   : > { %1572 = vst.msk [vmem:[%s2353_s23 + $0x58] sm:$0xff] %vm1351_vm4, %v1556_v19  ;;  %v1555_v23 = vmax.f32 %v1517_v20, 0.0  ;;  %v1532_v24 = vadd.f32 %v2012_v22, %v1735_v14 }
 0x3fb   : > { %v1526_v25 = vpop.f32.mrf.mxu1 }
 0x3fc   : > { %1571 = vst.msk [vmem:[%s2353_s23 + $0x50] sm:$0xff] %vm1351_vm4, %v1555_v23  ;;  %v1558_v26 = vmax.f32 %v1532_v24, 0.0  ;;  %v1527_v27 = vadd.f32 %v1735_v14, %v1526_v25 }
 0x3fd   : > { %v2015_v28 = vpop.f32.mrf.mxu1 }
 0x3fe   : > { %1574 = vst.msk [vmem:[%s2353_s23 + $0x68] sm:$0xff] %vm1351_vm4, %v1558_v26  ;;  %v1557_v29 = vmax.f32 %v1527_v27, 0.0  ;;  %v1542_v30 = vadd.f32 %v2015_v28, %v1735_v14 }
 0x3ff   : > { %v1536_v31 = vpop.f32.mrf.mxu1 }
 0x400   : > { %1573 = vst.msk [vmem:[%s2353_s23 + $0x60] sm:$0xff] %vm1351_vm4, %v1557_v29  ;;  %v1560_v32 = vmax.f32 %v1542_v30, 0.0  ;;  %v1537_v33 = vadd.f32 %v1735_v14, %v1536_v31 }
 0x402   : > { %1576 = vst.msk [vmem:[%s2353_s23 + $0x78] sm:$0xff] %vm1351_vm4, %v1560_v32  ;;  %v1559_v34 = vmax.f32 %v1537_v33, 0.0 }
 0x404   : > { %1575 = vst.msk [vmem:[%s2353_s23 + $0x70] sm:$0xff] %vm1351_vm4, %v1559_v34 }
 0x405 PF: > { %s31_s29 = sadd.s32 1, %s2188_s29   ;;  %s2643_s0 = sld [smem:[#allocation9_spill]] }
 0x406   : > { %p28_p11 = scmp.ge.s32.totalorder %s31_s29, 11   ;;  %s2644_s14 = sld [smem:[#allocation10_spill]] }
 0x407   : > { %s2645_s23 = smov %s2168_s24  ;;  %s2646_s24 = smov %s2312_s13 }
 0x408   : > { %s2647_s25 = smov %s2180_s27  ;;  %s2648_s26 = smov %s2184_s28 }
 0x409   :  { %30 = sbr.rel (!%p28_p11) target bundleno = 29 (0x1d), region = 146 }
 0x40b   : > { %s2649_s27 = smov %s2643_s0 }
 0x40c   : > { %s2650_s28 = smov %s2644_s14 }

</bundles_post_ra>
